<compile_context>
chip_gen: v7x
topology: tpu7x:2x2x1
jax: 0.10.0
libtpu: 0.0.40
codegen_flags: <defaults>
</compile_context>

<pallas_src>
import math

import jax
import jax.numpy as jnp
from jax.experimental import pallas as pl
from jax.experimental.pallas import tpu as pltpu


def _round_up(v, m):
    return (v + m - 1) // m * m


def _lane_pad(d):
    """Pad a feature dim to a multiple of 128 only if the overhead is <= 25%."""
    dp = _round_up(d, 128)
    return dp if dp * 4 <= d * 5 else d


# ----------------------------------------------------------------------------
# Pallas kernel: one (seq-tile, batch) block per grid step.
# ----------------------------------------------------------------------------
def _vnp_kernel(bias_ref,   # (1, 1, Hp)    temb + fc1.b + fc1_1.b (padded), f32
                x_ref,      # (1, TS, Cin)  compute dtype
                y_ref,      # (1, TS, Cin)  compute dtype
                w1_ref,     # (Cin, Hp)     fc1 weight  (padded, compute dtype)
                w11_ref,    # (Cin, Hp)     fc1_1 weight
                w2_ref,     # (Hp, Cop)     fc2 weight
                b2_ref,     # (1, Cop)      fc2 bias, f32
                out_ref):   # (1, TS, Cop)  x.dtype
    # fc1 / fc1_1 without materializing concat([x, y]): two MXU matmuls, f32 acc.
    h = jnp.dot(x_ref[0], w1_ref[...], preferred_element_type=jnp.float32)
    h = h + jnp.dot(y_ref[0], w11_ref[...], preferred_element_type=jnp.float32)
    # Pre-folded per-batch bias (time-embedding MLP + both fc1 biases).
    h = h + bias_ref[0]
    # Swish in f32 (EUP sigmoid; no bf16 VPU/EUP on v5e).
    h = h * jax.nn.sigmoid(h)
    # TODO(synk): F.dropout is stochastic; kernel implements inference behavior (identity).
    out = jnp.dot(h.astype(w2_ref.dtype), w2_ref[...],
                  preferred_element_type=jnp.float32) + b2_ref[...]
    out_ref[0] = out.astype(out_ref.dtype)


# ----------------------------------------------------------------------------
# Parameter construction (matches TimeEmbedding / Visual_Noise_Pre init).
# ----------------------------------------------------------------------------
def make_params(key, T, ch, in_ch):
    tdim = in_ch // 2

    # Sinusoidal table, exactly as TimeEmbedding.__init__ (interleaved sin/cos).
    freqs = jnp.exp(-(jnp.arange(0, ch, 2, dtype=jnp.float32) / ch)
                    * math.log(10000.0))                              # (ch//2,)
    pos = jnp.arange(T, dtype=jnp.float32)
    ang = pos[:, None] * freqs[None, :]                               # (T, ch//2)
    emb_table = jnp.stack([jnp.sin(ang), jnp.cos(ang)], axis=-1).reshape(T, ch)

    def xavier(k, fan_in, fan_out):
        bound = math.sqrt(6.0 / (fan_in + fan_out))
        # Stored transposed to (in, out) so kernels do plain x @ W.
        return jax.random.uniform(k, (fan_in, fan_out), jnp.float32, -bound, bound)

    k = jax.random.split(key, 5)
    return dict(
        emb_table=emb_table,
        te_w1=xavier(k[0], ch, tdim),    te_b1=jnp.zeros((1, tdim), jnp.float32),
        te_w2=xavier(k[1], tdim, tdim),  te_b2=jnp.zeros((1, tdim), jnp.float32),
        w1=xavier(k[2], in_ch, tdim),    b1=jnp.zeros((1, tdim), jnp.float32),
        w11=xavier(k[3], in_ch, tdim),   b11=jnp.zeros((1, tdim), jnp.float32),
        w2=xavier(k[4], tdim, in_ch),    b2=jnp.zeros((1, in_ch), jnp.float32),
    )


# ----------------------------------------------------------------------------
# One-time weight prep (pad + cast) — hoist out of the per-call path.
# ----------------------------------------------------------------------------
def prepare_params(params, *, compute_dtype=jnp.float32):
    in_ch, tdim = params["w1"].shape
    Hp, Cop = _lane_pad(tdim), _lane_pad(in_ch)
    return dict(
        w1=jnp.pad(params["w1"], ((0, 0), (0, Hp - tdim))).astype(compute_dtype),
        w11=jnp.pad(params["w11"], ((0, 0), (0, Hp - tdim))).astype(compute_dtype),
        w2=jnp.pad(params["w2"],
                   ((0, Hp - tdim), (0, Cop - in_ch))).astype(compute_dtype),
        b2=jnp.pad(params["b2"], ((0, 0), (0, Cop - in_ch))).astype(jnp.float32),
    )


# ----------------------------------------------------------------------------
# Wrapper: plain-JAX glue (time-MLP, bias fold) + pallas_call.
# ----------------------------------------------------------------------------
def visual_noise_pre(x, t, y, params, *, compute_dtype=None, prepared=None,
                     seq_tile=1024):
    B, S, in_ch = x.shape
    tdim = in_ch // 2
    out_dtype = x.dtype
    if compute_dtype is None:
        compute_dtype = x.dtype
    isz = jnp.dtype(compute_dtype).itemsize
    osz = jnp.dtype(out_dtype).itemsize

    Hp, Cop = _lane_pad(tdim), _lane_pad(in_ch)

    if prepared is None:
        prepared = prepare_params(params, compute_dtype=compute_dtype)
    w1, w11, w2, b2 = prepared["w1"], prepared["w11"], prepared["w2"], prepared["b2"]

    # --- glue: TimeEmbedding MLP (tiny M=1 matmuls), fold all row-biases -----
    emb = params["emb_table"][t]                                     # (B, ch)
    t1 = emb @ params["te_w1"] + params["te_b1"]
    t1 = t1 * jax.nn.sigmoid(t1)
    temb = t1 @ params["te_w2"] + params["te_b2"]                    # (B, tdim)
    bias = temb + params["b1"] + params["b11"]                       # (B, tdim) f32
    if Hp != tdim:
        bias = jnp.pad(bias, ((0, 0), (0, Hp - tdim)))
    bias = bias[:, None, :]                                          # (B, 1, Hp)

    # --- tile sizing from per-generation VMEM capacity ------------------------
    row_align = max(8, 32 // isz)                  # 8 rows f32, 16 rows bf16
    try:
        info = pltpu.get_tpu_info()
        vmem_cap = int(getattr(info, "vmem_capacity_bytes", 64 << 20))
    except Exception:                               # conservative: fits everywhere
        vmem_cap = 64 << 20
    vmem_budget = int(0.7 * vmem_cap)

    fixed = (2 * Hp * 4                    # bias (double-buffered, per batch)
             + 2 * in_ch * Hp * isz        # w1 + w11  (single-buffered)
             + Hp * Cop * isz              # w2        (single-buffered)
             + Cop * 4)                    # b2
    per_row = 2 * (2 * in_ch * isz + Cop * osz)    # x, y, out (double-buffered)
    ts_cap = (vmem_budget - fixed) // max(per_row, 1)
    ts_cap = max(row_align, ts_cap // row_align * row_align)

    S_al = _round_up(S, row_align)
    TS = min(seq_tile, S_al, ts_cap)
    TS = max(row_align, TS // row_align * row_align)
    S_pad = TS * pl.cdiv(S, TS)
    n_seq = S_pad // TS

    # --- inputs: cast only if a distinct compute dtype was requested; pad only
    #     the ragged sequence tail (usually a no-op) ---------------------------
    xk = x.astype(compute_dtype)
    yk = y.astype(compute_dtype)
    if S_pad != S:
        pad = ((0, 0), (0, S_pad - S), (0, 0))
        xk = jnp.pad(xk, pad)
        yk = jnp.pad(yk, pad)

    # --- grid: put the longer axis first so megacore sharding stays balanced --
    if n_seq >= B:
        grid = (n_seq, B)
        bias_map = lambda s, b: (b, 0, 0)
        row_map = lambda s, b: (b, s, 0)
    else:
        grid = (B, n_seq)
        bias_map = lambda b, s: (b, 0, 0)
        row_map = lambda b, s: (b, s, 0)
    w_map = lambda i, j: (0, 0)                     # grid-invariant

    block_bytes = fixed + per_row * TS
    vmem_limit = int(min(0.92 * vmem_cap, max(2 * block_bytes, 32 << 20)))

    out = pl.pallas_call(
        _vnp_kernel,
        out_shape=jax.ShapeDtypeStruct((B, S_pad, Cop), out_dtype),
        grid_spec=pltpu.PrefetchScalarGridSpec(
            num_scalar_prefetch=0,
            grid=grid,
            in_specs=[
                pl.BlockSpec((1, 1, Hp), bias_map),                  # folded bias
                pl.BlockSpec((1, TS, in_ch), row_map),               # x
                pl.BlockSpec((1, TS, in_ch), row_map),               # y
                pl.BlockSpec((in_ch, Hp), w_map,
                             pipeline_mode=pl.Buffered(1)),          # fc1.w
                pl.BlockSpec((in_ch, Hp), w_map,
                             pipeline_mode=pl.Buffered(1)),          # fc1_1.w
                pl.BlockSpec((Hp, Cop), w_map,
                             pipeline_mode=pl.Buffered(1)),          # fc2.w
                pl.BlockSpec((1, Cop), w_map,
                             pipeline_mode=pl.Buffered(1)),          # fc2.b
            ],
            out_specs=pl.BlockSpec((1, TS, Cop), row_map),
        ),
        compiler_params=pltpu.CompilerParams(
            dimension_semantics=("parallel", "parallel"),
            vmem_limit_bytes=vmem_limit),
    )(bias, xk, yk, w1, w11, w2, b2)

    # Strip padding only if any was applied (otherwise this is a no-op / elided).
    if S_pad != S or Cop != in_ch:
        out = out[:, :S, :in_ch]
    return out


# ----------------------------------------------------------------------------
# Pure-JAX reference (same math, eval-mode dropout).
# ----------------------------------------------------------------------------
def visual_noise_pre_ref(x, t, y, params):
    emb = params["emb_table"][t]                                     # (B, ch)
    t1 = emb @ params["te_w1"] + params["te_b1"]
    t1 = t1 * jax.nn.sigmoid(t1)
    temb = (t1 @ params["te_w2"] + params["te_b2"])[:, None, :]      # (B, 1, tdim)
    h = x @ params["w1"] + params["b1"]
    h_y = y @ params["w11"] + params["b11"]
    h = h + temb + h_y
    h = h * jax.nn.sigmoid(h)
    return h @ params["w2"] + params["b2"]


if __name__ == "__main__":
    T, ch = 100, 32
    key = jax.random.PRNGKey(0)

    # ---- test 1: tiny module shapes (in_ch=32 -> no lane padding, batch-major grid)
    in_ch, B, S = 32, 2, 8
    kp, kx, ky, kt, key = jax.random.split(key, 5)
    params = make_params(kp, T, ch, in_ch)
    x = jax.random.normal(kx, (B, S, in_ch), jnp.float32)
    y = jax.random.normal(ky, (B, S, in_ch), jnp.float32)
    t = jax.random.randint(kt, (B,), 0, T)
    ref = visual_noise_pre_ref(x, t, y, params)

    prepared = prepare_params(params, compute_dtype=jnp.float32)
    out = jax.block_until_ready(visual_noise_pre(x, t, y, params, prepared=prepared))
    assert out.shape == ref.shape and out.dtype == x.dtype
    assert jnp.allclose(out, ref, atol=1e-3, rtol=1e-3)

    # bf16 compute path (input quantization + f32 accumulate) — loose tolerance.
    out_bf16 = jax.block_until_ready(
        visual_noise_pre(x, t, y, params, compute_dtype=jnp.bfloat16))
    assert out_bf16.shape == ref.shape
    assert jnp.allclose(out_bf16.astype(jnp.float32), ref, atol=2.5e-1, rtol=1e-1)

    # ---- test 2: larger features / ragged seq (lane-padded output, seq-major grid,
    #              multiple sequence tiles, padded sequence tail)
    in_ch2, B2, S2 = 320, 2, 200
    kp2, kx2, ky2, kt2, key = jax.random.split(key, 5)
    params2 = make_params(kp2, T, ch, in_ch2)
    x2 = jax.random.normal(kx2, (B2, S2, in_ch2), jnp.float32)
    y2 = jax.random.normal(ky2, (B2, S2, in_ch2), jnp.float32)
    t2 = jax.random.randint(kt2, (B2,), 0, T)
    ref2 = visual_noise_pre_ref(x2, t2, y2, params2)
    out2 = jax.block_until_ready(
        visual_noise_pre(x2, t2, y2, params2, seq_tile=128))
    assert out2.shape == ref2.shape
    # Tolerance accounts for TPU default (bf16-input) matmul precision noise
    # between two mathematically identical computations at these magnitudes.
    assert jnp.allclose(out2, ref2, atol=2e-2, rtol=2e-2)

    print("KERNEL_OK")
</pallas_src>

<mosaic_0001>
module attributes {stable_mosaic.version = 11 : i64} {
  func.func @_vnp_kernel(%arg0: i32, %arg1: i32, %arg2: memref<1x1x16xf32, #tpu.memory_space<vmem>>, %arg3: memref<1x8x32xf32, #tpu.memory_space<vmem>>, %arg4: memref<1x8x32xf32, #tpu.memory_space<vmem>>, %arg5: memref<32x16xf32, #tpu.memory_space<vmem>>, %arg6: memref<32x16xf32, #tpu.memory_space<vmem>>, %arg7: memref<16x32xf32, #tpu.memory_space<vmem>>, %arg8: memref<1x32xf32, #tpu.memory_space<vmem>>, %arg9: memref<1x8x32xf32, #tpu.memory_space<vmem>>) attributes {dimension_semantics = [#tpu.dimension_semantics<parallel>, #tpu.dimension_semantics<parallel>], iteration_bounds = array<i64: 2, 1>, scalar_prefetch = 0 : i64, scratch_operands = 0 : i64, tpu.core_type = #tpu.core_type<tc>, window_params = [{transform_indices = @transform_0, window_bounds = array<i64: 1, 1, 16>}, {transform_indices = @transform_1, window_bounds = array<i64: 1, 8, 32>}, {transform_indices = @transform_2, window_bounds = array<i64: 1, 8, 32>}, {pipeline_mode = #tpu.pipeline_mode<synchronous>, transform_indices = @transform_3, window_bounds = array<i64: 32, 16>}, {pipeline_mode = #tpu.pipeline_mode<synchronous>, transform_indices = @transform_4, window_bounds = array<i64: 32, 16>}, {pipeline_mode = #tpu.pipeline_mode<synchronous>, transform_indices = @transform_5, window_bounds = array<i64: 16, 32>}, {pipeline_mode = #tpu.pipeline_mode<synchronous>, transform_indices = @transform_6, window_bounds = array<i64: 1, 32>}, {transform_indices = @transform_7, window_bounds = array<i64: 1, 8, 32>}]} {
    %c0 = arith.constant 0 : index
    %c0_0 = arith.constant 0 : index
    %c0_1 = arith.constant 0 : index
    %0 = vector.load %arg3[%c0, %c0_0, %c0_1] : memref<1x8x32xf32, #tpu.memory_space<vmem>>, vector<1x8x32xf32>
    %1 = vector.shape_cast %0 : vector<1x8x32xf32> to vector<8x32xf32>
    %c0_2 = arith.constant 0 : index
    %c0_3 = arith.constant 0 : index
    %2 = vector.load %arg5[%c0_2, %c0_3] : memref<32x16xf32, #tpu.memory_space<vmem>>, vector<32x16xf32>
    %cst = arith.constant dense<0.000000e+00> : vector<8x16xf32>
    %3 = tpu.matmul %1, %2, %cst {dimension_numbers = #tpu.dot_dimension_numbers<[1], [0], [0], [1], [0, 0, 1, 1], [], []>} : vector<8x32xf32>, vector<32x16xf32>, vector<8x16xf32> -> vector<8x16xf32>
    %c0_4 = arith.constant 0 : index
    %c0_5 = arith.constant 0 : index
    %c0_6 = arith.constant 0 : index
    %4 = vector.load %arg4[%c0_4, %c0_5, %c0_6] : memref<1x8x32xf32, #tpu.memory_space<vmem>>, vector<1x8x32xf32>
    %5 = vector.shape_cast %4 : vector<1x8x32xf32> to vector<8x32xf32>
    %c0_7 = arith.constant 0 : index
    %c0_8 = arith.constant 0 : index
    %6 = vector.load %arg6[%c0_7, %c0_8] : memref<32x16xf32, #tpu.memory_space<vmem>>, vector<32x16xf32>
    %cst_9 = arith.constant dense<0.000000e+00> : vector<8x16xf32>
    %7 = tpu.matmul %5, %6, %cst_9 {dimension_numbers = #tpu.dot_dimension_numbers<[1], [0], [0], [1], [0, 0, 1, 1], [], []>} : vector<8x32xf32>, vector<32x16xf32>, vector<8x16xf32> -> vector<8x16xf32>
    %8 = arith.addf %3, %7 : vector<8x16xf32>
    %c0_10 = arith.constant 0 : index
    %c0_11 = arith.constant 0 : index
    %c0_12 = arith.constant 0 : index
    %9 = vector.load %arg2[%c0_10, %c0_11, %c0_12] : memref<1x1x16xf32, #tpu.memory_space<vmem>>, vector<1x1x16xf32>
    %10 = vector.shape_cast %9 : vector<1x1x16xf32> to vector<1x16xf32>
    %11 = vector.broadcast %10 : vector<1x16xf32> to vector<8x16xf32>
    %12 = arith.addf %8, %11 : vector<8x16xf32>
    %13 = arith.negf %12 : vector<8x16xf32>
    %14 = math.exp %13 : vector<8x16xf32>
    %cst_13 = arith.constant 1.000000e+00 : f32
    %15 = vector.broadcast %cst_13 : f32 to vector<8x16xf32>
    %16 = arith.addf %15, %14 : vector<8x16xf32>
    %17 = arith.divf %15, %16 : vector<8x16xf32>
    %18 = arith.mulf %12, %17 : vector<8x16xf32>
    %c0_14 = arith.constant 0 : index
    %c0_15 = arith.constant 0 : index
    %19 = vector.load %arg7[%c0_14, %c0_15] : memref<16x32xf32, #tpu.memory_space<vmem>>, vector<16x32xf32>
    %cst_16 = arith.constant dense<0.000000e+00> : vector<8x32xf32>
    %20 = tpu.matmul %18, %19, %cst_16 {dimension_numbers = #tpu.dot_dimension_numbers<[1], [0], [0], [1], [0, 0, 1, 1], [], []>} : vector<8x16xf32>, vector<16x32xf32>, vector<8x32xf32> -> vector<8x32xf32>
    %c0_17 = arith.constant 0 : index
    %c0_18 = arith.constant 0 : index
    %21 = vector.load %arg8[%c0_17, %c0_18] : memref<1x32xf32, #tpu.memory_space<vmem>>, vector<1x32xf32>
    %22 = vector.broadcast %21 : vector<1x32xf32> to vector<8x32xf32>
    %23 = arith.addf %20, %22 : vector<8x32xf32>
    %c0_19 = arith.constant 0 : index
    %c0_20 = arith.constant 0 : index
    %c0_21 = arith.constant 0 : index
    %24 = vector.load %arg9[%c0_19, %c0_20, %c0_21] : memref<1x8x32xf32, #tpu.memory_space<vmem>>, vector<1x8x32xf32>
    %25 = vector.shape_cast %24 : vector<1x8x32xf32> to vector<8x32xf32>
    %26 = vector.shape_cast %23 : vector<8x32xf32> to vector<1x8x32xf32>
    tpu.vector_store %arg9[%c0_19, %c0_20, %c0_21], %26 {strides = array<i32>} : memref<1x8x32xf32, #tpu.memory_space<vmem>>, vector<1x8x32xf32>,
    return
  }
  func.func @transform_0(%arg0: i32, %arg1: i32) -> (i32, i32, i32) {
    %c0_i32 = arith.constant 0 : i32
    %c0_i32_0 = arith.constant 0 : i32
    %c0_i32_1 = arith.constant 0 : i32
    return %arg0, %c0_i32, %c0_i32_0 : i32, i32, i32
  }
  func.func @transform_1(%arg0: i32, %arg1: i32) -> (i32, i32, i32) {
    %c0_i32 = arith.constant 0 : i32
    %c0_i32_0 = arith.constant 0 : i32
    return %arg0, %arg1, %c0_i32 : i32, i32, i32
  }
  func.func @transform_2(%arg0: i32, %arg1: i32) -> (i32, i32, i32) {
    %c0_i32 = arith.constant 0 : i32
    %c0_i32_0 = arith.constant 0 : i32
    return %arg0, %arg1, %c0_i32 : i32, i32, i32
  }
  func.func @transform_3(%arg0: i32, %arg1: i32) -> (i32, i32) {
    %c0_i32 = arith.constant 0 : i32
    %c0_i32_0 = arith.constant 0 : i32
    %c0_i32_1 = arith.constant 0 : i32
    return %c0_i32, %c0_i32_0 : i32, i32
  }
  func.func @transform_4(%arg0: i32, %arg1: i32) -> (i32, i32) {
    %c0_i32 = arith.constant 0 : i32
    %c0_i32_0 = arith.constant 0 : i32
    %c0_i32_1 = arith.constant 0 : i32
    return %c0_i32, %c0_i32_0 : i32, i32
  }
  func.func @transform_5(%arg0: i32, %arg1: i32) -> (i32, i32) {
    %c0_i32 = arith.constant 0 : i32
    %c0_i32_0 = arith.constant 0 : i32
    %c0_i32_1 = arith.constant 0 : i32
    return %c0_i32, %c0_i32_0 : i32, i32
  }
  func.func @transform_6(%arg0: i32, %arg1: i32) -> (i32, i32) {
    %c0_i32 = arith.constant 0 : i32
    %c0_i32_0 = arith.constant 0 : i32
    %c0_i32_1 = arith.constant 0 : i32
    return %c0_i32, %c0_i32_0 : i32, i32
  }
  func.func @transform_7(%arg0: i32, %arg1: i32) -> (i32, i32, i32) {
    %c0_i32 = arith.constant 0 : i32
    %c0_i32_0 = arith.constant 0 : i32
    return %arg0, %arg1, %c0_i32 : i32, i32, i32
  }
}

</mosaic_0001>

<bundles_post_ra>
// kernel: tpu_custom_call.1
= control target key start
LH: loop header
LB: loop body
LE: loop exit
PB: predicated region body
PF: predicated region fallthrough
CT: control target
= control target key end

     0   :  { %12 = vsyncpa [#allocation3], 0  ;;  %s1125_s0 = inlined_call_operand.vmem [shape: f32[2,1,16], index: 0, kind: input, shape index: {}]   ;;  %s1126_s1 = inlined_call_operand.vmem [shape: f32[2,8,32], index: 1, kind: input, shape index: {}]   ;;  %s1127_s2 = inlined_call_operand.vmem [shape: f32[2,8,32], index: 2, kind: input, shape index: {}]   ;;  %s1128_s3 = inlined_call_operand.vmem [shape: f32[32,16], index: 3, kind: input, shape index: {}]   ;;  %s1129_s4 = inlined_call_operand.vmem [shape: f32[32,16], index: 4, kind: input, shape index: {}]   ;;  %s1130_s5 = inlined_call_operand.vmem [shape: f32[16,32], index: 5, kind: input, shape index: {}]   ;;  %s1131_s6 = inlined_call_operand.vmem [shape: f32[1,32], index: 6, kind: input, shape index: {}]   ;;  %s1132_s7 = inlined_call_operand.hbm [shape: f32[2,8,32], index: 7, kind: output, shape index: {}]  }
   0x1   :  { %14 = vsyncpa [#allocation3 + $0x1], 0  ;;  %s968_s24 = smov 0   ;;  %s970_s25 = smov 0  }
   0x2   :  { %s972_s26 = smov 0   ;;  %s974_s27 = smov 0  }
   0x3   :  { %s976_s28 = smov 0   ;;  %s978_s29 = smov 0  }
   0x4 LB: > { %s707_s30 = sadd.s32 4294967295, %s922_s29   ;;  %s708_s8 = sadd.s32 4294967294, %s922_s29   ;;  %s922_s29 = sphi %s978_s29, %s20_s29   ;;  %s918_s28 = sphi %s976_s28, %s1139_s28   ;;  %s914_s27 = sphi %s974_s27, %s1138_s27   ;;  %s910_s26 = sphi %s972_s26, %s1137_s26   ;;  %s906_s25 = sphi %s970_s25, %s1136_s25   ;;  %s902_s24 = sphi %s968_s24, %s1135_s24  }
   0x5   : > { %s32_s9 = sadd.s32 1, %s918_s28  ;;  %s207_s10 = sadd.s32 1, %s910_s26 }
   0x6   : > { %p34_p0 = scmp.ge.s32.totalorder %s32_s9, 2  ;;  %p217_p1 = scmp.ne.s32.totalorder %s910_s26, %s906_s25 }
   0x7   : > { %p218_p2 = scmp.eq.s32.totalorder %s707_s30, 1  ;;  %p223_p3 = scmp.ne.s32.totalorder %s906_s25, %s902_s24 }
   0x8   : > { %s1141_s9 = smov (%p34_p0, %s32_s9), 0  ;;  %p224_p5 = scmp.eq.s32.totalorder %s708_s8, 1 }
   0x9   : > { %p1008_p4 = por %p218_p2, %p217_p1  ;;  %s202_s12 = ssub.s32 %s918_s28, %s1141_s9 }
   0xa   : > { %p711_p6 = scmp.ge.s32.totalorder %s922_s29, 1  ;;  %p205_p7 = scmp.eq.s32.totalorder %s202_s12, 0 }
   0xb   : > { %p1015_p8 = por %p224_p5, %p223_p3  ;;  %p280_p9 = scmp.lt.s32.totalorder %s922_s29, 3 }
   0xc   : > { %s1021_s14 = scalar_select %p205_p7, %s910_s26, %s207_s10  }
   0xd   : > { %p281_p10 = pnand %p711_p6, %p280_p9 }
   0xe   : > { %v347_v0 = vld [vmem:[%s1129_s4] sm:$0xff] (!%p281_p10)  ;;  %v348_v1 = vld [vmem:[%s1129_s4 + $0x8] sm:$0xff] (!%p281_p10)  ;;  %v924_v3 = vmov (!%p281_p10), 0.0|0.0   ;;  %v349_v6 = vld [vmem:[%s1129_s4 + $0x10] sm:$0xff] (!%p281_p10)  ;;  %p324_p11 = scmp.lt.s32.totalorder (!%p281_p10), %s914_s27, 1  ;;  %vm925_vm0 = vmmov (!%p281_p10), 0  }
   0xf   : > { %284 = sbr.rel (%p281_p10) target bundleno = 500 (0x1f4), region = 48  ;;  %v342_v2 = vld [vmem:[%s1128_s3] sm:$0xff] (!%p281_p10)  ;;  %767 = vmatprep.subr.bf16.mxu0 (!%p281_p10), %v924_v3  ;;  %773 = vmatprep.subr.bf16.mxu1 (!%p281_p10), %v924_v3  ;;  %v768_v4 = vpack.c.bf16 (!%p281_p10), %v348_v1, %v347_v0  ;;  %v343_v5 = vld [vmem:[%s1128_s3 + $0x8] sm:$0xff] (!%p281_p10)  ;;  %v350_v7 = vld [vmem:[%s1129_s4 + $0x18] sm:$0xff] (!%p281_p10)  ;;  %v926_v11 = vmov (!%p281_p10), 0.0   ;;  %vm351_vm1 = vcmask (!%p281_p10), 261120  }
  0x10   : > { %v774_v8 = vpack.c.bf16 (!%p281_p10), %v343_v5, %v342_v2  ;;  %v344_v9 = vld [vmem:[%s1128_s3 + $0x10] sm:$0xff] (!%p281_p10)  ;;  %v345_v10 = vld [vmem:[%s1128_s3 + $0x18] sm:$0xff] (!%p281_p10)  ;;  %746 = vmatprep.mubr.msk.f32.mxu0 (!%p281_p10), %vm925_vm0, %v926_v11  ;;  %757 = vmatprep.mubr.msk.f32.mxu1 (!%p281_p10), %vm925_vm0, %v926_v11  ;;  %v771_v12 = vpack.c.bf16 (!%p281_p10), %v350_v7, %v349_v6  ;;  %v513_v16 = vld [vmem:[%s1130_s5] sm:$0xff] (!%p281_p10)  ;;  %vm522_vm2 = vcmask (!%p281_p10), 130048   ;;  %s722_s30 = sshll.u32 (!%p281_p10), %s914_s27, 7 }
  0x11   : > { %769 = vmatpush3.bf16.msra.mxu0 (!%p281_p10), %v768_v4  ;;  %v777_v13 = vpack.c.bf16 (!%p281_p10), %v345_v10, %v344_v9  ;;  %v514_v17 = vld [vmem:[%s1130_s5 + $0x8] sm:$0xff] (!%p281_p10)  ;;  %v719_v31 = vld [vmem:[%s1131_s6] ss:$0 sm:$0xff] (!%p281_p10)  ;;  %s1077_s16 = scalar_lea.hbm (!%p281_p10), %s1132_s7, %s722_s30 }
  0x12   : > { %775 = vmatpush3.bf16.msra.mxu1 (!%p281_p10), %v774_v8  ;;  %770 = vmatprep.subr.bf16.mxu0 (!%p281_p10), %v924_v3  ;;  %v780_v18 = vpack.c.bf16 (!%p281_p10), %v514_v17, %v513_v16 }
  0x13   : > { %776 = vmatprep.subr.bf16.mxu1 (!%p281_p10), %v924_v3 }
  0x15   : > { %772 = vmatpush3.bf16.msra.mxu0 (!%p281_p10), %v771_v12 }
  0x16   : > { %s325_s18 = scalar_select %p324_p11, %s914_s27, 1  ;;  %778 = vmatpush3.bf16.msra.mxu1 %v777_v13  ;;  %779 = vmatprep.subr.bf16.mxu0 %v924_v3 }
  0x17   : > { %s927_s27 = smov [#allocation2]  }
  0x18   : > { %s713_s19 = sshll.u32 %s325_s18, 3  ;;  %s326_s20 = scalar_lea.vmem %s1125_s0, %s325_s18 }
  0x19   : > { %s340_s22 = scalar_lea.vmem %s1127_s2, %s713_s19  ;;  %s333_s8 = scalar_lea.vmem %s1126_s1, %s713_s19  ;;  %v717_v21 = vld [vmem:[%s326_s20] ss:$0 sm:$0xff] }
  0x1a   : > { %v346_v14 = vld [vmem:[%s340_s22] sm:$0xff]  ;;  %s321_s18 = sand.u32 1, %s906_s25   ;;  %s848_s20 = sshll.u32 %s927_s27, 4  ;;  %s849_s20 = int_to_ptr.vmem [resolvable:$false] %s848_s20 }
  0x1b   : > { %v341_v15 = vld [vmem:[%s333_s8] sm:$0xff]  ;;  %747 = vmatmul.mubr.msk.f32.vlgmr.msra.gmra.mrb[0].mxu0 %vm351_vm1, %v346_v14  ;;  %s712_s21 = sshll.u32 %s321_s18, 3  ;;  %s598_s17 = scalar_lea.sflag [#allocation3], %s321_s18 }
  0x1c   : > { %758 = vmatmul.mubr.msk.f32.vlgmr.msra.gmra.mrb[0].mxu1 %vm351_vm1, %v341_v15  ;;  %764 = vmatprep.mubr.msk.f32.mxu0 %vm925_vm0, %v926_v11  ;;  %s323_s8 = scalar_lea.vmem [#allocation2], %s712_s21  ;;  %s850_s21 = scalar_lea.vmem %s849_s20, 256 }
  0x1d   : > { %781 = vmatpush3.bf16.msra.mxu0 %v780_v18  ;;  %s612_s10 = sshll.u32 %s323_s8, 4  ;;  %s1079_s10 = int_to_ptr.vmem [resolvable:$true] %s612_s10 }
  0x1e   : > { %s844_s19 = scalar_lea.vmem %s1079_s10, 128  ;;  %p851_p1 = scmp.lt.s32.totalorder %s1079_s10, %s849_s20 }
  0x1f   : > { %p845_p12 = scmp.ne.s32.totalorder %s1079_s10, %s844_s19  ;;  %p852_p2 = scmp.lt.s32.totalorder %s850_s21, %s844_s19 }
  0x21   : > { %p846_p13 = pnand %p845_p12, %p1008_p4  ;;  %p853_p3 = por %p852_p2, %p851_p1 }
  0x23   : > { %p847_p0 = pneg %p846_p13 }
  0x25   : > { %p854_p5 = pnand %p853_p3, %p847_p0 }
  0xee   : > { %v421_v19 = vpop.f32.mrb[0].mxu0 }
  0xef   : > { %v494_v20 = vpop.f32.mrb[0].mxu1  ;;  %v748_v22 = vpop.f32.mrb[1].mxu0 }
  0xf0   : > { %v495_v23 = vadd.f32 %v494_v20, %v421_v19  ;;  %v759_v24 = vpop.f32.mrb[1].mxu1 }
  0xf2   : > { %v505_v25 = vadd.f32 %v717_v21, %v495_v23 }
  0xf4   : > { %v718_v26 = vmul.f32 -1.442695, %v505_v25 }
  0xf6   : > { %840 = vpow2.f32 %v718_v26 }
 0x100   : > { %v841_v27 = vpop.eup %840 }
 0x101   : > { %v509_v28 = vadd.f32 1.0, %v841_v27 }
 0x103   : > { %842 = vrcp.f32 %v509_v28 }
 0x10d   : > { %v843_v29 = vpop.eup %842 }
 0x10e   : > { %v512_v30 = vmul.f32 %v843_v29, %v505_v25 }
 0x110   : > { %765 = vmatmul.mubr.msk.f32.vlgmr.msra.gmra.mrb[2].mxu0 %vm522_vm2, %v512_v30 }
 0x1e3   : > { %v592_v32 = vpop.f32.mrb[2].mxu0 }
 0x1e4   : > { %v593_v33 = vadd.f32 %v719_v31, %v592_v32  ;;  %v766_v34 = vpop.f32.mrb[3].mxu0 }
 0x1e6   : > { %596 = vst.msk [vmem:[%s323_s8] sm:$0xff] %vm351_vm1, %v593_v33 }
 0x1e7   : > { %857 = shalt.err (!%p854_p5)
}
 0x1e8   : > { %s858_s18 = scalar_lea.hbm %s1077_s16, 128  ;;  %s862_s30 = scalar_lea.hbm %s1132_s7, 256 }
 0x1e9   : > { %p859_p6 = scmp.ne.s32.totalorder %s1077_s16, %s858_s18  ;;  %p863_p10 = scmp.lt.u32.totalorder %s1077_s16, %s1132_s7 }
 0x1ea   : > { %p864_p11 = scmp.lt.u32.totalorder %s862_s30, %s858_s18  ;;  %p866_p13 = scmp.lt.u32.totalorder %s858_s18, %s1077_s16 }
 0x1eb   : > { %p860_p7 = pnand %p859_p6, %p1008_p4 }
 0x1ec   : > { %p865_p12 = por %p864_p11, %p863_p10 }
 0x1ed   : > { %p861_p9 = pneg %p860_p7 }
 0x1ee   : > { %p867_p0 = por %p866_p13, %p865_p12 }
 0x1f0   : > { %p868_p1 = pnand %p867_p0, %p861_p9 }
 0x1f2   : > { %871 = shalt.err (!%p868_p1)
}
 0x1f3   : > { %782 = dma.vmem_to_hbm [thread:$0]  (%p1008_p4), %s1079_s10, 128, %s1077_s16, %s598_s17  }
 0x1f4 PF: > { %p788_p2 = scmp.ge.s32.totalorder %s922_s29, 2  ;;  %s624_s15 = sand.u32 1, %s902_s24  }
 0x1f5   : > { %s625_s19 = scalar_lea.sflag [#allocation3], %s624_s15 }
 0x1f6   : > { %p785_p3 = pnand %p788_p2, %p1015_p8 }
 0x1f8   : > { %897 = dma.done.wait (!%p785_p3), %s625_s19, 128  }
 0x1f9   : > { %899 = vsyncadd (!%p785_p3), %s625_s19, 4294967168  ;;  %s20_s29 = sadd.s32 1, %s922_s29   ;;  %s1135_s24 = smov %s906_s25 }
 0x1fa   : > { %p17_p5 = scmp.ge.s32.totalorder %s20_s29, 4   ;;  %s1136_s25 = smov %s910_s26 }
 0x1fb   : > { %s1137_s26 = smov %s1021_s14  ;;  %s1138_s27 = smov %s918_s28 }
 0x1fc   : > { %s1139_s28 = smov %s1141_s9  ;;  %19 = sbr.rel (!%p17_p5) target bundleno = 4 (0x4), region = 89 }
 0x203   :  { %630 = vsyncpa [#allocation3], 1 }
 0x204   :  { %632 = vsyncpa [#allocation3 + $0x1], 1 }

</bundles_post_ra>
